<compile_context>
chip_gen: v7x
topology: tpu7x:2x2x1
jax: 0.10.0
libtpu: 0.0.40
codegen_flags: <defaults>
</compile_context>

<pallas_src>
import jax
import jax.numpy as jnp
from jax import lax
from jax.experimental import pallas as pl
from jax.experimental.pallas import tpu as pltpu


_LANE = 128  # pad filter / tag dims to the TPU lane width


def _round_up(x, m):
    return (x + m - 1) // m * m


# --------------------------------------------------------------------------- #
# kernel
# --------------------------------------------------------------------------- #
def _make_kernel(tile_b, seq_len, window_size, nwords, compute_dtype):
    l_out = seq_len - window_size + 1
    rows = tile_b * seq_len          # rows processed per grid step

    def kernel(ids_ref,     # VMEM (rows, 1) int32     word ids for this batch tile
               table_ref,   # VMEM (nwords, C)         embedding table (resident)
               wconv_ref,   # VMEM (K*C, F_pad)        im2col conv weight (resident)
               bconv_ref,   # VMEM (1, F_pad) f32      conv bias
               whead_ref,   # VMEM (F_pad, T_pad)      linear head weight (resident)
               bhead_ref,   # VMEM (1, T_pad) f32      head bias
               out_ref):    # VMEM (tile_b, T_pad) f32
        # ---- embedding gather as a one-hot MXU matmul (no serial loop) ------
        ids = ids_ref[...]                                        # (rows, 1) i32
        word_iota = lax.broadcasted_iota(jnp.int32, (rows, nwords), 1)
        onehot = (ids == word_iota).astype(compute_dtype)         # (rows, nwords)
        g = jnp.dot(onehot, table_ref[...],
                    preferred_element_type=jnp.float32)           # (rows, C) f32
        g = g.astype(compute_dtype)

        # ---- im2col: ONE wide matmul (rows, K*C) @ (K*C, F_pad) -------------
        # tap k of row r needs embedding row r + k (wrap-around rows are masked
        # out below, before the max-over-time).
        taps = [g]
        for k in range(1, window_size):
            taps.append(jnp.concatenate([g[k:, :], g[:k, :]], axis=0))
        ic = jnp.concatenate(taps, axis=-1)                       # (rows, K*C)
        h = jnp.dot(ic, wconv_ref[...],
                    preferred_element_type=jnp.float32)           # (rows, F_pad)

        # ---- mask conv windows crossing a sentence boundary (t >= L_out) ----
        # cheap (rows, 1) predicate, broadcast along lanes by the where.
        t_in_sent = lax.broadcasted_iota(jnp.int32, (rows, 1), 0) % seq_len
        h = jnp.where(t_in_sent < l_out, h, -1e30)

        # ---- max over time per sentence (reshape + reduce), bias, ReLU ------
        # (seq_len a multiple of 8 keeps this reshape a pure re-tiling.)
        hmax = jnp.max(h.reshape(tile_b, seq_len, h.shape[-1]), axis=1)
        hrelu = jnp.maximum(hmax + bconv_ref[...], 0.0)           # (tile_b, F_pad)

        # ---- classifier / regressor head, lane-dense (tile_b, T_pad) store --
        out_ref[...] = (
            jnp.dot(hrelu.astype(compute_dtype), whead_ref[...],
                    preferred_element_type=jnp.float32)
            + bhead_ref[...])

    return kernel


# --------------------------------------------------------------------------- #
# one-time weight packing (hoisted out of the per-call path)
# --------------------------------------------------------------------------- #
def pack_params(params, compute_dtype=jnp.float32):
    emb = jnp.asarray(params["embedding"], jnp.float32)            # (nwords, C)
    conv_w = jnp.asarray(params["conv_w"], jnp.float32)            # (F, C, K)
    num_filters, emb_size, window_size = conv_w.shape
    f_pad = _round_up(num_filters, _LANE)
    t_pad = _LANE                                                  # ntags <= 128

    # Table stored in the compute dtype: halves the resident VMEM footprint and
    # gather bandwidth on the bf16 path (v7x's 64 MiB VMEM).
    table = emb.astype(compute_dtype)

    # Conv1d weight -> im2col layout: row index k*C + c, cols = filters (padded).
    w_im2col = jnp.transpose(conv_w, (2, 1, 0)).reshape(window_size * emb_size,
                                                        num_filters)
    w_im2col = jnp.pad(w_im2col,
                       ((0, 0), (0, f_pad - num_filters))).astype(compute_dtype)
    b_conv = jnp.pad(jnp.asarray(params["conv_b"], jnp.float32).reshape(1, -1),
                     ((0, 0), (0, f_pad - num_filters)))

    def pack_head(w, b):
        w = jnp.asarray(w, jnp.float32)                            # (T, F)
        b = jnp.asarray(b, jnp.float32).reshape(1, -1)             # (1, T)
        t = w.shape[0]
        assert t <= t_pad, "ntags > 128 would need a tiled head"
        w_t = jnp.pad(w.T, ((0, f_pad - num_filters),
                            (0, t_pad - t))).astype(compute_dtype)
        b_p = jnp.pad(b, ((0, 0), (0, t_pad - t)))
        return w_t, b_p, t

    w_cls, b_cls, ntags = pack_head(params["cls_w"], params["cls_b"])
    w_reg, b_reg, _ = pack_head(params["reg_w"], params["reg_b"])

    return dict(table=table, w_conv=w_im2col, b_conv=b_conv,
                w_cls=w_cls, b_cls=b_cls, w_reg=w_reg, b_reg=b_reg,
                window_size=window_size, emb_size=emb_size,
                num_filters=num_filters, f_pad=f_pad, t_pad=t_pad,
                ntags=ntags, compute_dtype=compute_dtype)


# --------------------------------------------------------------------------- #
# forward wrappers
# --------------------------------------------------------------------------- #
def cnn_class_forward_batch(words, packed, *, is_regress=False, tile_b=32):
    """words: (B, L) or (L,) int32 word ids.  Returns (B, ntags) or (B, 1)."""
    words = jnp.asarray(words, jnp.int32)
    if words.ndim == 1:
        words = words[None, :]
    bsz, seq_len = words.shape
    window_size = packed["window_size"]
    if seq_len < window_size:
        raise ValueError(f"seq_len={seq_len} must be >= window_size={window_size}")

    nwords, emb_size = packed["table"].shape
    if nwords > 4096:
        # TODO(synk): large-vocab path (pl.ANY table + manual DMA row gather).
        raise NotImplementedError("one-hot gather path assumes a small vocabulary")

    # ---- batch tile: large (fills MXU M dim), but keep >=2 grid steps when the
    #      batch allows so v7x's second TensorCore gets work.
    b_ceil = _round_up(bsz, 8)
    tile_b = max(8, _round_up(min(tile_b, b_ceil), 8))
    if b_ceil // tile_b < 2 and b_ceil >= 16:
        tile_b = max(8, _round_up(b_ceil // 2, 8))
    b_pad = _round_up(bsz, tile_b)

    if b_pad != bsz:
        words = jnp.pad(words, ((0, b_pad - bsz), (0, 0)))   # pad with word id 0
    ids = words.reshape(b_pad * seq_len, 1)                  # blocked VMEM input

    f_pad, t_pad = packed["f_pad"], packed["t_pad"]
    n_out = 1 if is_regress else packed["ntags"]
    w_head = packed["w_reg"] if is_regress else packed["w_cls"]
    b_head = packed["b_reg"] if is_regress else packed["b_cls"]

    rows = tile_b * seq_len
    kernel = _make_kernel(tile_b, seq_len, window_size, nwords,
                          packed["compute_dtype"])

    const = lambda i: (0, 0)                                 # weights stay resident
    in_specs = [
        pl.BlockSpec((rows, 1), lambda i: (i, 0)),                  # word ids
        pl.BlockSpec((nwords, emb_size), const),                    # embedding table
        pl.BlockSpec((window_size * emb_size, f_pad), const),       # conv weight
        pl.BlockSpec((1, f_pad), const),                            # conv bias
        pl.BlockSpec((f_pad, t_pad), const),                        # head weight
        pl.BlockSpec((1, t_pad), const),                            # head bias
    ]
    out_specs = pl.BlockSpec((tile_b, t_pad), lambda i: (i, 0))

    # Explicit VMEM budget: 2x-buffered resident weights + gather/im2col temps,
    # with ~2x headroom (floor 8 MiB, cap 100 MiB).
    wbytes = sum(int(x.size) * x.dtype.itemsize
                 for x in (packed["table"], packed["w_conv"], packed["b_conv"],
                           w_head, b_head))
    tmp_bytes = rows * (nwords + 2 * window_size * emb_size + 2 * f_pad) * 4
    io_bytes = 2 * (rows * 4 + tile_b * t_pad * 4)
    vmem_limit = int(min(100 * 2**20,
                         max(2 * (2 * wbytes + tmp_bytes + io_bytes), 8 * 2**20)))

    out = pl.pallas_call(
        kernel,
        out_shape=jax.ShapeDtypeStruct((b_pad, t_pad), jnp.float32),
        grid=(b_pad // tile_b,),
        in_specs=in_specs,
        out_specs=out_specs,
        compiler_params=pltpu.CompilerParams(
            dimension_semantics=("parallel",),
            vmem_limit_bytes=vmem_limit),
    )(ids, packed["table"], packed["w_conv"], packed["b_conv"], w_head, b_head)
    return out[:bsz, :n_out]


def cnn_class_forward(words, packed, is_regress=False):
    """Single-sentence forward matching the PyTorch module: (L,) -> (1, T)."""
    return cnn_class_forward_batch(words, packed, is_regress=is_regress)


# --------------------------------------------------------------------------- #
# init + pure-JAX reference
# --------------------------------------------------------------------------- #
def init_params(key, nwords, emb_size, num_filters, window_size, ntags):
    k_emb, k_cw, k_cb, k_clw, k_rw = jax.random.split(key, 5)
    emb_w = jax.random.uniform(k_emb, (nwords, emb_size),
                               minval=-0.25, maxval=0.25, dtype=jnp.float32)
    fan_conv = emb_size * window_size
    bnd = 1.0 / jnp.sqrt(jnp.float32(fan_conv))
    conv_w = jax.random.uniform(k_cw, (num_filters, emb_size, window_size),
                                minval=-bnd, maxval=bnd, dtype=jnp.float32)
    conv_b = jax.random.uniform(k_cb, (num_filters,),
                                minval=-bnd, maxval=bnd, dtype=jnp.float32)
    lim_cls = jnp.sqrt(6.0 / (num_filters + ntags))
    cls_w = jax.random.uniform(k_clw, (ntags, num_filters),
                               minval=-lim_cls, maxval=lim_cls, dtype=jnp.float32)
    cls_b = jnp.zeros((ntags,), jnp.float32)
    lim_reg = jnp.sqrt(6.0 / (num_filters + 1))
    reg_w = jax.random.uniform(k_rw, (1, num_filters),
                               minval=-lim_reg, maxval=lim_reg, dtype=jnp.float32)
    reg_b = jnp.zeros((1,), jnp.float32)
    return dict(embedding=emb_w, conv_w=conv_w, conv_b=conv_b,
                cls_w=cls_w, cls_b=cls_b, reg_w=reg_w, reg_b=reg_b)


def _reference_forward(words, params, is_regress=False):
    emb = params["embedding"][words]                       # (L, C)
    F, C, K = params["conv_w"].shape
    L = emb.shape[0]
    L_out = L - K + 1
    patches = jnp.stack([emb[t:t + K, :] for t in range(L_out)], axis=0)  # (L_out,K,C)
    h = jnp.einsum("tkc,fck->tf", patches, params["conv_w"],
                   precision="highest") + params["conv_b"]
    h = jnp.maximum(jnp.max(h, axis=0, keepdims=True), 0.0)               # (1, F)
    if is_regress:
        return jnp.dot(h, params["reg_w"].T, precision="highest") + params["reg_b"]
    return jnp.dot(h, params["cls_w"].T, precision="highest") + params["cls_b"]


# --------------------------------------------------------------------------- #
if __name__ == "__main__":
    nwords, emb_size, num_filters, window_size, ntags = 100, 32, 16, 3, 5
    seq_len, batch = 8, 16

    key = jax.random.PRNGKey(0)
    k_params, k_words = jax.random.split(key)
    params = init_params(k_params, nwords, emb_size, num_filters, window_size, ntags)
    words = jax.random.randint(k_words, (batch, seq_len), 0, nwords, dtype=jnp.int32)

    ref_cls = jnp.concatenate(
        [_reference_forward(words[b], params, is_regress=False) for b in range(batch)], 0)
    ref_reg = jnp.concatenate(
        [_reference_forward(words[b], params, is_regress=True) for b in range(batch)], 0)

    # f32 operands --------------------------------------------------------- #
    packed = pack_params(params, compute_dtype=jnp.float32)
    out_cls = jax.block_until_ready(cnn_class_forward_batch(words, packed, is_regress=False))
    out_reg = jax.block_until_ready(cnn_class_forward_batch(words, packed, is_regress=True))
    assert out_cls.shape == (batch, ntags) and out_reg.shape == (batch, 1)
    assert jnp.allclose(out_cls, ref_cls, atol=1e-3, rtol=1e-3)
    assert jnp.allclose(out_reg, ref_reg, atol=1e-3, rtol=1e-3)

    # bf16 MXU operands + bf16-resident table, f32 accumulation ------------- #
    packed_bf16 = pack_params(params, compute_dtype=jnp.bfloat16)
    out_bf16 = jax.block_until_ready(
        cnn_class_forward_batch(words, packed_bf16, is_regress=False))
    assert jnp.allclose(out_bf16, ref_cls, atol=5e-2, rtol=5e-2)

    # single-sentence API (parity with the PyTorch module's forward) -------- #
    out_one = jax.block_until_ready(cnn_class_forward(words[0], packed, is_regress=False))
    assert out_one.shape == (1, ntags)
    assert jnp.allclose(out_one, ref_cls[:1], atol=1e-3, rtol=1e-3)

    print("KERNEL_OK")
</pallas_src>

<mosaic_0001>
module attributes {stable_mosaic.version = 11 : i64} {
  func.func @kernel(%arg0: i32, %arg1: memref<64x1xi32, #tpu.memory_space<vmem>>, %arg2: memref<100x32xf32, #tpu.memory_space<vmem>>, %arg3: memref<96x128xf32, #tpu.memory_space<vmem>>, %arg4: memref<1x128xf32, #tpu.memory_space<vmem>>, %arg5: memref<128x128xf32, #tpu.memory_space<vmem>>, %arg6: memref<1x128xf32, #tpu.memory_space<vmem>>, %arg7: memref<8x128xf32, #tpu.memory_space<vmem>>) attributes {dimension_semantics = [#tpu.dimension_semantics<parallel>], iteration_bounds = array<i64: 2>, scalar_prefetch = 0 : i64, scratch_operands = 0 : i64, tpu.core_type = #tpu.core_type<tc>, window_params = [{transform_indices = @transform_0, window_bounds = array<i64: 64, 1>}, {pipeline_mode = #tpu.pipeline_mode<synchronous>, transform_indices = @transform_1, window_bounds = array<i64: 100, 32>}, {pipeline_mode = #tpu.pipeline_mode<synchronous>, transform_indices = @transform_2, window_bounds = array<i64: 96, 128>}, {pipeline_mode = #tpu.pipeline_mode<synchronous>, transform_indices = @transform_3, window_bounds = array<i64: 1, 128>}, {pipeline_mode = #tpu.pipeline_mode<synchronous>, transform_indices = @transform_4, window_bounds = array<i64: 128, 128>}, {pipeline_mode = #tpu.pipeline_mode<synchronous>, transform_indices = @transform_5, window_bounds = array<i64: 1, 128>}, {transform_indices = @transform_6, window_bounds = array<i64: 8, 128>}]} {
    %c0 = arith.constant 0 : index
    %c0_0 = arith.constant 0 : index
    %0 = vector.load %arg1[%c0, %c0_0] : memref<64x1xi32, #tpu.memory_space<vmem>>, vector<64x1xi32>
    %1 = tpu.iota {dimensions = array<i32: 1>} : vector<64x100xi32>
    %2 = vector.broadcast %0 : vector<64x1xi32> to vector<64x100xi32>
    %3 = arith.cmpi eq, %2, %1 : vector<64x100xi32>
    %4 = arith.extui %3 : vector<64x100xi1> to vector<64x100xi32>
    %5 = arith.sitofp %4 : vector<64x100xi32> to vector<64x100xf32>
    %c0_1 = arith.constant 0 : index
    %c0_2 = arith.constant 0 : index
    %6 = vector.load %arg2[%c0_1, %c0_2] : memref<100x32xf32, #tpu.memory_space<vmem>>, vector<100x32xf32>
    %cst = arith.constant dense<0.000000e+00> : vector<64x32xf32>
    %7 = tpu.matmul %5, %6, %cst {dimension_numbers = #tpu.dot_dimension_numbers<[1], [0], [0], [1], [0, 0, 1, 1], [], []>} : vector<64x100xf32>, vector<100x32xf32>, vector<64x32xf32> -> vector<64x32xf32>
    %8 = vector.extract_strided_slice %7 {offsets = [1, 0], sizes = [63, 32], strides = [1, 1]} : vector<64x32xf32> to vector<63x32xf32>
    %9 = vector.extract_strided_slice %7 {offsets = [0, 0], sizes = [1, 32], strides = [1, 1]} : vector<64x32xf32> to vector<1x32xf32>
    %10 = tpu.concatenate %8, %9 in 0 : vector<63x32xf32>, vector<1x32xf32> -> vector<64x32xf32>
    %11 = vector.extract_strided_slice %7 {offsets = [2, 0], sizes = [62, 32], strides = [1, 1]} : vector<64x32xf32> to vector<62x32xf32>
    %12 = vector.extract_strided_slice %7 {offsets = [0, 0], sizes = [2, 32], strides = [1, 1]} : vector<64x32xf32> to vector<2x32xf32>
    %13 = tpu.concatenate %11, %12 in 0 : vector<62x32xf32>, vector<2x32xf32> -> vector<64x32xf32>
    %14 = tpu.concatenate %7, %10, %13 in 1 : vector<64x32xf32>, vector<64x32xf32>, vector<64x32xf32> -> vector<64x96xf32>
    %c0_3 = arith.constant 0 : index
    %c0_4 = arith.constant 0 : index
    %15 = vector.load %arg3[%c0_3, %c0_4] : memref<96x128xf32, #tpu.memory_space<vmem>>, vector<96x128xf32>
    %cst_5 = arith.constant dense<0.000000e+00> : vector<64x128xf32>
    %16 = tpu.matmul %14, %15, %cst_5 {dimension_numbers = #tpu.dot_dimension_numbers<[1], [0], [0], [1], [0, 0, 1, 1], [], []>} : vector<64x96xf32>, vector<96x128xf32>, vector<64x128xf32> -> vector<64x128xf32>
    %17 = tpu.iota {dimensions = array<i32: 0>} : vector<64x1xi32>
    %c8_i32 = arith.constant 8 : i32
    %c0_i32 = arith.constant 0 : i32
    %18 = arith.cmpi eq, %c8_i32, %c0_i32 : i32
    %c1_i32 = arith.constant 1 : i32
    %19 = arith.select %18, %c1_i32, %c8_i32 : i32
    %20 = vector.broadcast %19 : i32 to vector<64x1xi32>
    %21 = arith.remsi %17, %20 : vector<64x1xi32>
    %c0_i32_6 = arith.constant 0 : i32
    %22 = vector.broadcast %c0_i32_6 : i32 to vector<64x1xi32>
    %23 = arith.cmpi ne, %21, %22 : vector<64x1xi32>
    %c0_i32_7 = arith.constant 0 : i32
    %24 = vector.broadcast %c0_i32_7 : i32 to vector<64x1xi32>
    %25 = arith.cmpi slt, %21, %24 : vector<64x1xi32>
    %c0_i32_8 = arith.constant 0 : i32
    %26 = arith.cmpi slt, %19, %c0_i32_8 : i32
    %27 = vector.broadcast %26 : i1 to vector<64x1xi1>
    %28 = vector.broadcast %27 : vector<64x1xi1> to vector<64x1xi1>
    %29 = arith.xori %25, %28 : vector<64x1xi1>
    %30 = arith.andi %29, %23 : vector<64x1xi1>
    %31 = vector.broadcast %19 : i32 to vector<64x1xi32>
    %32 = arith.addi %21, %31 : vector<64x1xi32>
    %33 = arith.select %30, %32, %21 : vector<64x1xi1>, vector<64x1xi32>
    %c6_i32 = arith.constant 6 : i32
    %34 = vector.broadcast %c6_i32 : i32 to vector<64x1xi32>
    %35 = arith.cmpi slt, %33, %34 : vector<64x1xi32>
    %cst_9 = arith.constant -1.000000e+30 : f32
    %36 = vector.shape_cast %35 : vector<64x1xi1> to vector<64x1xi1>
    %37 = vector.broadcast %36 : vector<64x1xi1> to vector<64x128xi1>
    %38 = vector.broadcast %cst_9 : f32 to vector<64x128xf32>
    %39 = arith.select %37, %16, %38 : vector<64x128xi1>, vector<64x128xf32>
    %40 = vector.shape_cast %39 : vector<64x128xf32> to vector<8x8x128xf32>
    %cst_10 = arith.constant dense<0xFF800000> : vector<8x128xf32>
    %41 = vector.multi_reduction <maximumf>, %40, %cst_10 [1] : vector<8x8x128xf32> to vector<8x128xf32>
    %c0_11 = arith.constant 0 : index
    %c0_12 = arith.constant 0 : index
    %42 = vector.load %arg4[%c0_11, %c0_12] : memref<1x128xf32, #tpu.memory_space<vmem>>, vector<1x128xf32>
    %43 = vector.broadcast %42 : vector<1x128xf32> to vector<8x128xf32>
    %44 = arith.addf %41, %43 : vector<8x128xf32>
    %cst_13 = arith.constant 0.000000e+00 : f32
    %45 = vector.broadcast %cst_13 : f32 to vector<8x128xf32>
    %46 = arith.maximumf %44, %45 : vector<8x128xf32>
    %c0_14 = arith.constant 0 : index
    %c0_15 = arith.constant 0 : index
    %47 = vector.load %arg5[%c0_14, %c0_15] : memref<128x128xf32, #tpu.memory_space<vmem>>, vector<128x128xf32>
    %cst_16 = arith.constant dense<0.000000e+00> : vector<8x128xf32>
    %48 = tpu.matmul %46, %47, %cst_16 {dimension_numbers = #tpu.dot_dimension_numbers<[1], [0], [0], [1], [0, 0, 1, 1], [], []>} : vector<8x128xf32>, vector<128x128xf32>, vector<8x128xf32> -> vector<8x128xf32>
    %c0_17 = arith.constant 0 : index
    %c0_18 = arith.constant 0 : index
    %49 = vector.load %arg6[%c0_17, %c0_18] : memref<1x128xf32, #tpu.memory_space<vmem>>, vector<1x128xf32>
    %50 = vector.broadcast %49 : vector<1x128xf32> to vector<8x128xf32>
    %51 = arith.addf %48, %50 : vector<8x128xf32>
    %c0_19 = arith.constant 0 : index
    %c0_20 = arith.constant 0 : index
    %52 = vector.load %arg7[%c0_19, %c0_20] : memref<8x128xf32, #tpu.memory_space<vmem>>, vector<8x128xf32>
    tpu.vector_store %arg7[%c0_19, %c0_20], %51 {strides = array<i32>} : memref<8x128xf32, #tpu.memory_space<vmem>>, vector<8x128xf32>,
    return
  }
  func.func @transform_0(%arg0: i32) -> (i32, i32) {
    %c0_i32 = arith.constant 0 : i32
    %c0_i32_0 = arith.constant 0 : i32
    return %arg0, %c0_i32 : i32, i32
  }
  func.func @transform_1(%arg0: i32) -> (i32, i32) {
    %c0_i32 = arith.constant 0 : i32
    %c0_i32_0 = arith.constant 0 : i32
    %c0_i32_1 = arith.constant 0 : i32
    return %c0_i32, %c0_i32_0 : i32, i32
  }
  func.func @transform_2(%arg0: i32) -> (i32, i32) {
    %c0_i32 = arith.constant 0 : i32
    %c0_i32_0 = arith.constant 0 : i32
    %c0_i32_1 = arith.constant 0 : i32
    return %c0_i32, %c0_i32_0 : i32, i32
  }
  func.func @transform_3(%arg0: i32) -> (i32, i32) {
    %c0_i32 = arith.constant 0 : i32
    %c0_i32_0 = arith.constant 0 : i32
    %c0_i32_1 = arith.constant 0 : i32
    return %c0_i32, %c0_i32_0 : i32, i32
  }
  func.func @transform_4(%arg0: i32) -> (i32, i32) {
    %c0_i32 = arith.constant 0 : i32
    %c0_i32_0 = arith.constant 0 : i32
    %c0_i32_1 = arith.constant 0 : i32
    return %c0_i32, %c0_i32_0 : i32, i32
  }
  func.func @transform_5(%arg0: i32) -> (i32, i32) {
    %c0_i32 = arith.constant 0 : i32
    %c0_i32_0 = arith.constant 0 : i32
    %c0_i32_1 = arith.constant 0 : i32
    return %c0_i32, %c0_i32_0 : i32, i32
  }
  func.func @transform_6(%arg0: i32) -> (i32, i32) {
    %c0_i32 = arith.constant 0 : i32
    %c0_i32_0 = arith.constant 0 : i32
    return %arg0, %c0_i32 : i32, i32
  }
}

</mosaic_0001>

<bundles_post_ra>
// kernel: tpu_custom_call.1
= control target key start
LH: loop header
LB: loop body
LE: loop exit
PB: predicated region body
PF: predicated region fallthrough
CT: control target
= control target key end

     0   :  { %11 = vsyncpa [#allocation3], 0  ;;  %s1881_s0 = inlined_call_operand.vmem [shape: s32[128,1], index: 0, kind: input, shape index: {}]   ;;  %s1882_s1 = inlined_call_operand.vmem [shape: f32[100,32], index: 1, kind: input, shape index: {}]   ;;  %s1883_s2 = inlined_call_operand.vmem [shape: f32[96,128], index: 2, kind: input, shape index: {}]   ;;  %s1884_s3 = inlined_call_operand.vmem [shape: f32[1,128], index: 3, kind: input, shape index: {}]   ;;  %s1885_s4 = inlined_call_operand.vmem [shape: f32[128,128], index: 4, kind: input, shape index: {}]   ;;  %s1886_s5 = inlined_call_operand.vmem [shape: f32[1,128], index: 5, kind: input, shape index: {}]   ;;  %s1887_s6 = inlined_call_operand.hbm [shape: f32[16,128], index: 6, kind: output, shape index: {}]  }
   0x1   :  { %13 = vsyncpa [#allocation3 + $0x1], 0  ;;  %s1548_s21 = smov 0   ;;  %s1550_s22 = smov 0  }
   0x2   :  { %s1552_s23 = smov 0   ;;  %s1554_s24 = smov 0  }
   0x3 LB: > { %s1569_s25 = sadd.s32 4294967295, %s1504_s24   ;;  %s1118_s26 = sadd.s32 4294967294, %s1504_s24   ;;  %s1504_s24 = sphi %s1554_s24, %s1893_s24   ;;  %s1500_s23 = sphi %s1552_s23, %s1892_s23   ;;  %s1496_s22 = sphi %s1550_s22, %s1891_s22   ;;  %s1492_s21 = sphi %s1548_s21, %s1890_s21  }
   0x4   : > { %s1573_s27 = sadd.s32 1, %s1504_s24   ;;  %s157_s28 = sadd.s32 1, %s1500_s23 }
   0x5   : > { %s154_s29 = ssub.s32 %s1504_s24, %s1573_s27  ;;  %p167_p0 = scmp.ne.s32.totalorder %s1500_s23, %s1496_s22 }
   0x6   : > { %p155_p1 = scmp.eq.s32.totalorder %s154_s29, 0  ;;  %p168_p2 = scmp.eq.s32.totalorder %s1569_s25, 1 }
   0x7   : > { %p173_p3 = scmp.ne.s32.totalorder %s1496_s22, %s1492_s21  ;;  %p174_p4 = scmp.eq.s32.totalorder %s1118_s26, 1 }
   0x8   : > { %s1584_s30 = scalar_select %p155_p1, %s1500_s23, %s157_s28  }
   0x9   : > { %p1586_p5 = por %p168_p2, %p167_p0  ;;  %p1590_p6 = por %p174_p4, %p173_p3 }
   0xa   : > { %p1121_p7 = scmp.ge.s32.totalorder %s1504_s24, 1  ;;  %p216_p8 = scmp.lt.s32.totalorder %s1504_s24, 3 }
   0xc   : > { %p217_p9 = pnand %p1121_p7, %p216_p8 }
   0xd   : > { %s1123_s9 = sshll.u32 (!%p217_p9), %s1569_s25, 3  ;;  %v310_v0 = vld [vmem:[%s1882_s1] sm:$0xff] (!%p217_p9)  ;;  %v311_v1 = vld [vmem:[%s1882_s1 + $0x8] sm:$0xff] (!%p217_p9)  ;;  %v312_v2 = vld [vmem:[%s1882_s1 + $0x10] sm:$0xff] (!%p217_p9)  ;;  %v1506_v3 = vmov (!%p217_p9), 0   ;;  %vm348_vm0 = vcmask (!%p217_p9), 1043456   ;;  %v260_v28 = vlaneseq (!%p217_p9) }
   0xe   : > { %220 = sbr.rel (%p217_p9) target bundleno = 985 (0x3d9), region = 44  ;;  %1441 = vset.pattern.permute.xlu1 (!%p217_p9), %v1506_v3  ;;  %1440 = vset.pattern.permute.xlu0 (!%p217_p9), %v1506_v3  ;;  %p247_p10 = scmp.lt.s32.totalorder (!%p217_p9), %s1123_s9, 15  ;;  %v1323_v4 = vpack.c.bf16 (!%p217_p9), %v311_v1, %v310_v0  ;;  %v313_v5 = vld [vmem:[%s1882_s1 + $0x18] sm:$0xff] (!%p217_p9)  ;;  %v314_v7 = vld [vmem:[%s1882_s1 + $0x20] sm:$0xff] (!%p217_p9)  ;;  %v315_v8 = vld [vmem:[%s1882_s1 + $0x28] sm:$0xff] (!%p217_p9)  ;;  %vm323_vm1 = vcmask (!%p217_p9), 818176  }
   0xf   : > { %v1327_v6 = vpack.c.bf16 (!%p217_p9), %v313_v5, %v312_v2  ;;  %v1331_v9 = vpack.c.bf16 (!%p217_p9), %v315_v8, %v314_v7  ;;  %v316_v10 = vld [vmem:[%s1882_s1 + $0x30] sm:$0xff] (!%p217_p9)  ;;  %v317_v13 = vld [vmem:[%s1882_s1 + $0x38] sm:$0xff] (!%p217_p9)  ;;  %v318_v17 = vld [vmem:[%s1882_s1 + $0x40] sm:$0xff] (!%p217_p9)  ;;  %v261_v29 = vand.u32 (!%p217_p9), 127, %v260_v28  ;;  %v1507_v32 = vmov (!%p217_p9), 0.0   ;;  %s1508_s19 = smov (!%p217_p9), 32  }
  0x10   : > { %1324 = vmatprep.subr.bf16.mxu0 (!%p217_p9), %v1323_v4  ;;  %v1335_v16 = vpack.c.bf16 (!%p217_p9), %v317_v13, %v316_v10  ;;  %v319_v18 = vld [vmem:[%s1882_s1 + $0x48] sm:$0xff] (!%p217_p9)  ;;  %v320_v22 = vld [vmem:[%s1882_s1 + $0x50] sm:$0xff] (!%p217_p9)  ;;  %v321_v23 = vld [vmem:[%s1882_s1 + $0x58] sm:$0xff] (!%p217_p9)  ;;  %vm465_vm10 = vcmask (!%p217_p9), 1046528   ;;  %vm484_vm11 = vcmask (!%p217_p9), 1045504   ;;  %s1509_s20 = smov (!%p217_p9), 64  }
  0x11   : > { %1326 = vmatpush3.bf16.msra.mxu0 (!%p217_p9), %v1323_v4  ;;  %v1339_v21 = vpack.c.bf16 (!%p217_p9), %v319_v18, %v318_v17  ;;  %v1343_v26 = vpack.c.bf16 (!%p217_p9), %v321_v23, %v320_v22  ;;  %v322_v27 = vld [vmem:[%s1882_s1 + $0x60] sm:$0xf] (!%p217_p9)  ;;  %v572_v48 = vld [vmem:[%s1883_s2 + $0x8] sm:$0xff] (!%p217_p9)  ;;  %v573_v49 = vld [vmem:[%s1883_s2 + $0x10] sm:$0xff] (!%p217_p9)  ;;  %vm553_vm12 = vcmask (!%p217_p9), 261120   ;;  %vm562_vm13 = vcmask (!%p217_p9), 523264  }
  0x12   : > { %1328 = vmatprep.subr.bf16.mxu0 (!%p217_p9), %v1327_v6  ;;  %v571_v47 = vld [vmem:[%s1883_s2] sm:$0xff] (!%p217_p9)  ;;  %v574_v51 = vld [vmem:[%s1883_s2 + $0x18] sm:$0xff] (!%p217_p9)  ;;  %v576_v54 = vld [vmem:[%s1883_s2 + $0x28] sm:$0xff] (!%p217_p9)  ;;  %vm583_vm14 = vcmask (!%p217_p9), 785408   ;;  %vm1511_vm15 = vmmov (!%p217_p9), 0   ;;  %s1153_s15 = sshll.u32 (!%p217_p9), %s1569_s25, 7 }
  0x13   : > { %v1347_v50 = vpack.c.bf16 (!%p217_p9), %v572_v48, %v571_v47  ;;  %v1351_v52 = vpack.c.bf16 (!%p217_p9), %v574_v51, %v573_v49  ;;  %v575_v53 = vld [vmem:[%s1883_s2 + $0x20] sm:$0xff] (!%p217_p9)  ;;  %v577_v56 = vld [vmem:[%s1883_s2 + $0x30] sm:$0xff] (!%p217_p9)  ;;  %v578_v57 = vld [vmem:[%s1883_s2 + $0x38] sm:$0xff] (!%p217_p9)  ;;  %s1512_s25 = smov (!%p217_p9), [#allocation2]  }
  0x14   : > { %v1355_v55 = vpack.c.bf16 (!%p217_p9), %v576_v54, %v575_v53  ;;  %v1359_v58 = vpack.c.bf16 (!%p217_p9), %v578_v57, %v577_v56  ;;  %v579_v59 = vld [vmem:[%s1883_s2 + $0x40] sm:$0xff] (!%p217_p9)  ;;  %v580_v60 = vld [vmem:[%s1883_s2 + $0x48] sm:$0xff] (!%p217_p9)  ;;  %v581_v62 = vld [vmem:[%s1883_s2 + $0x50] sm:$0xff] (!%p217_p9) }
  0x15   : > { %s1895_s9 = smov (!%p247_p10, %s1123_s9), 15  ;;  %1330 = vmatpush3.bf16.msra.mxu0 %v1327_v6  ;;  %1348 = vmatprep.subr.bf16.mxu1 %v1347_v50  ;;  %v1363_v61 = vpack.c.bf16 %v580_v60, %v579_v59  ;;  %v582_v63 = vld [vmem:[%s1883_s2 + $0x58] sm:$0xff] }
  0x16   : > { %s1124_s28 = sshll.u32 %s1895_s9, 3  ;;  %1332 = vmatprep.subr.bf16.mxu0 %v1331_v9  ;;  %1350 = vmatpush3.bf16.msra.mxu1 %v1347_v50  ;;  %v1367_v0 = vpack.c.bf16 %v582_v63, %v581_v62 }
  0x17   : > { %s250_s11 = scalar_lea.vmem %s1881_s0, %s1124_s28  ;;  %1352 = vmatprep.subr.bf16.mxu1 %v1351_v52  ;;  %s1446_s28 = sshll.u32 %s1512_s25, 4  ;;  %s1447_s28 = int_to_ptr.vmem [resolvable:$false] %s1446_s28 }
  0x18   : > { %v254_v11 = vld [vmem:[%s250_s11 + $0x10] sm:$0xff]  ;;  %v252_v12 = vld [vmem:[%s250_s11] sm:$0xff]  ;;  %v255_v14 = vld [vmem:[%s250_s11 + $0x18] sm:$0xff]  ;;  %s1448_s29 = scalar_lea.vmem %s1447_s28, 256 }
  0x19   : > { %269 = vperm.xlu1 %1441, %v254_v11   ;;  %263 = vperm.xlu0 %1440, %v252_v12   ;;  %v253_v15 = vld [vmem:[%s250_s11 + $0x8] sm:$0xff]  ;;  %v256_v20 = vld [vmem:[%s250_s11 + $0x20] sm:$0xff]  ;;  %v259_v24 = vld [vmem:[%s250_s11 + $0x38] sm:$0xff] }
  0x1a   : > { %v257_v19 = vld [vmem:[%s250_s11 + $0x28] sm:$0xff]  ;;  %1334 = vmatpush3.bf16.msra.mxu0 %v1331_v9  ;;  %v258_v25 = vld [vmem:[%s250_s11 + $0x30] sm:$0xff]  ;;  %1354 = vmatpush3.bf16.msra.mxu1 %v1351_v52  ;;  %s243_s11 = sand.u32 1, %s1496_s22  }
  0x1b   : > { %1336 = vmatprep.subr.bf16.mxu0 %v1335_v16  ;;  %1356 = vmatprep.subr.bf16.mxu1 %v1355_v55  ;;  %s1122_s12 = sshll.u32 %s243_s11, 3 }
  0x1c   : > { %s245_s9 = scalar_lea.vmem [#allocation2], %s1122_s12 }
  0x1d   : > { %272 = vperm.xlu1 %1441, %v255_v14   ;;  %266 = vperm.xlu0 %1440, %v253_v15   ;;  %s1059_s16 = sshll.u32 %s245_s9, 4  ;;  %s1841_s16 = int_to_ptr.vmem [resolvable:$true] %s1059_s16 }
  0x1e   : > { %1338 = vmatpush3.bf16.msra.mxu0 %v1335_v16  ;;  %1358 = vmatpush3.bf16.msra.mxu1 %v1355_v55  ;;  %s1442_s26 = scalar_lea.vmem %s1841_s16, 128  ;;  %p1449_p0 = scmp.lt.s32.totalorder %s1841_s16, %s1447_s28 }
  0x1f   : > { %1340 = vmatprep.subr.bf16.mxu0 %v1339_v21  ;;  %1360 = vmatprep.subr.bf16.mxu1 %v1359_v58  ;;  %p1443_p11 = scmp.ne.s32.totalorder %s1841_s16, %s1442_s26  ;;  %p1450_p1 = scmp.lt.s32.totalorder %s1448_s29, %s1442_s26 }
  0x21   : > { %278 = vperm.xlu1 %1441, %v257_v19   ;;  %275 = vperm.xlu0 %1440, %v256_v20   ;;  %p1444_p12 = pnand %p1443_p11, %p1586_p5  ;;  %p1451_p2 = por %p1450_p1, %p1449_p0 }
  0x22   : > { %1342 = vmatpush3.bf16.msra.mxu0 %v1339_v21  ;;  %1362 = vmatpush3.bf16.msra.mxu1 %v1359_v58 }
  0x23   : > { %1344 = vmatprep.subr.bf16.mxu0 %v1343_v26  ;;  %1364 = vmatprep.subr.bf16.mxu1 %v1363_v61  ;;  %p1445_p13 = pneg %p1444_p12 }
  0x25   : > { %284 = vperm.xlu1 %1441, %v259_v24   ;;  %281 = vperm.xlu0 %1440, %v258_v25   ;;  %p1452_p3 = pnand %p1451_p2, %p1445_p13 }
  0x26   : > { %1346 = vmatpush3.bf16.msra.mxu0 %v1343_v26  ;;  %1366 = vmatpush3.bf16.msra.mxu1 %v1363_v61 }
  0x27   : > { %1238 = vmatprep.subr.msk.mxu0 %vm348_vm0, %v322_v27  ;;  %1368 = vmatprep.subr.bf16.mxu1 %v1367_v0 }
  0x2a   : > { %1239 = vmatpush3.msk.msra.mxu0 %vm348_vm0, %v322_v27  ;;  %1370 = vmatpush3.bf16.msra.mxu1 %v1367_v0 }
  0x98   : > { %v270_v30 = vpop.permute.xlu1 %269  ;;  %v264_v31 = vpop.permute.xlu0 %263 }
  0x99   : > { %vm286_vm2 = vcmp.eq.s32.totalorder %v264_v31, %v261_v29  ;;  %vm288_vm3 = vcmp.eq.s32.totalorder %v270_v30, %v261_v29 }
  0x9a   : > { %v1125_v33 = vsel %vm286_vm2, 1.0, %v1507_v32  ;;  %v1127_v36 = vsel %vm288_vm3, 1.0, %v1507_v32 }
  0x9b   : > { %1240 = vmatprep.mubr.msk.f32.mxu0 %vm323_vm1, %v1125_v33 }
  0x9c   : > { %v273_v34 = vpop.permute.xlu1 %272  ;;  %v267_v35 = vpop.permute.xlu0 %266 }
  0x9d   : > { %vm287_vm4 = vcmp.eq.s32.totalorder %v267_v35, %v261_v29  ;;  %vm289_vm5 = vcmp.eq.s32.totalorder %v273_v34, %v261_v29 }
  0x9e   : > { %v1126_v37 = vsel %vm287_vm4, 1.0, %v1507_v32  ;;  %v1128_v40 = vsel %vm289_vm5, 1.0, %v1507_v32  ;;  %vm953_vm4 = vcmask 1041409  }
  0x9f   : > { %1241 = vmatmul.mubr.msk.f32.vlgmr.msra.gmra.mrb[0].mxu0 %vm323_vm1, %v1126_v37 }
  0xa0   : > { %v279_v38 = vpop.permute.xlu1 %278  ;;  %1243 = vmatprep.mubr.msk.f32.mxu0 %vm323_vm1, %v1127_v36  ;;  %v276_v39 = vpop.permute.xlu0 %275 }
  0xa1   : > { %vm290_vm6 = vcmp.eq.s32.totalorder %v276_v39, %v261_v29  ;;  %vm291_vm7 = vcmp.eq.s32.totalorder %v279_v38, %v261_v29 }
  0xa2   : > { %v1129_v41 = vsel %vm290_vm6, 1.0, %v1507_v32  ;;  %v1130_v44 = vsel %vm291_vm7, 1.0, %v1507_v32 }
  0xa3   : > { %1244 = vmatmul.mubr.msk.f32.gmra.mrb[2].mxu0 %vm323_vm1, %v1128_v40 }
  0xa4   : > { %v285_v42 = vpop.permute.xlu1 %284  ;;  %1246 = vmatprep.mubr.msk.f32.mxu0 %vm323_vm1, %v1129_v41  ;;  %v282_v43 = vpop.permute.xlu0 %281 }
  0xa5   : > { %vm292_vm8 = vcmp.eq.s32.totalorder %v282_v43, %v261_v29  ;;  %vm293_vm9 = vcmp.eq.s32.totalorder %v285_v42, %v261_v29 }
  0xa6   : > { %v1131_v45 = vsel %vm292_vm8, 1.0, %v1507_v32  ;;  %v1132_v46 = vsel %vm293_vm9, 1.0, %v1507_v32  ;;  %vm956_vm9 = vcmask 1042434  }
  0xa7   : > { %1247 = vmatmul.mubr.msk.f32.gmra.mrb[4].mxu0 %vm323_vm1, %v1130_v44 }
  0xa8   : > { %1249 = vmatprep.mubr.msk.f32.mxu0 %vm323_vm1, %v1131_v45 }
  0xab   : > { %1250 = vmatmul.mubr.msk.f32.gmra.mrb[6].mxu0 %vm323_vm1, %v1132_v46 }
 0x172   : > { %v1692_v1 = vpop.f32.mrb[0].mxu0 }
 0x173   : > { %v467_v2 = vrot.slane %v1692_v1, 1  ;;  %v486_v3 = vrot.slane %v1692_v1, 2  ;;  %v418_v4 = vpop.f32.mrb[1].mxu0 }
 0x174   : > { %v466_v5 = vrot.slane %v418_v4, 1  ;;  %v485_v6 = vrot.slane %v418_v4, 2 }
 0x176   : > { %v1696_v7 = vpop.f32.mrb[2].mxu0  ;;  %v468_v8 = vsel %vm465_vm10, %v466_v5, %v467_v2  ;;  %v487_v9 = vsel %vm484_vm11, %v485_v6, %v486_v3 }
 0x177   : > { %v471_v10 = vrot.slane %v1696_v7, 1  ;;  %v490_v11 = vrot.slane %v1696_v7, 2  ;;  %504 = vrot.lane.b32.xlu0 %v468_v8, %s1508_s19  ;;  %v428_v12 = vpop.f32.mrb[3].mxu0 }
 0x178   : > { %v469_v13 = vrot.slane %v428_v12, 1  ;;  %v488_v14 = vrot.slane %v428_v12, 2 }
 0x17a   : > { %v1703_v15 = vpop.f32.mrb[4].mxu0  ;;  %v470_v16 = vsel %vm465_vm10, %v467_v2, %v469_v13  ;;  %v472_v17 = vsel %vm465_vm10, %v469_v13, %v471_v10  ;;  %v489_v18 = vsel %vm484_vm11, %v486_v3, %v488_v14  ;;  %v491_v19 = vsel %vm484_vm11, %v488_v14, %v490_v11 }
 0x17b   : > { %v475_v20 = vrot.slane %v1703_v15, 1  ;;  %v494_v21 = vrot.slane %v1703_v15, 2  ;;  %529 = vrot.lane.b32.xlu0 %v487_v9, %s1509_s20  ;;  %506 = vrot.lane.b32.xlu1 %v470_v16, %s1508_s19  ;;  %v438_v22 = vpop.f32.mrb[5].mxu0  ;;  %v1510_v14 = vmov 0.0|0.0   ;;  %v924_v16 = vld [vmem:[%s1885_s4 + $0x18] sm:$0xff] }
 0x17c   : > { %v473_v23 = vrot.slane %v438_v22, 1  ;;  %v492_v24 = vrot.slane %v438_v22, 2  ;;  %1371 = vmatprep.subr.bf16.mxu1 %v1510_v14 }
 0x17e   : > { %v1713_v25 = vpop.f32.mrb[6].mxu0  ;;  %v474_v26 = vsel %vm465_vm10, %v471_v10, %v473_v23  ;;  %v476_v27 = vsel %vm465_vm10, %v473_v23, %v475_v20  ;;  %v493_v29 = vsel %vm484_vm11, %v490_v11, %v492_v24  ;;  %v495_v30 = vsel %vm484_vm11, %v492_v24, %v494_v21  ;;  %v921_v11 = vld [vmem:[%s1885_s4] sm:$0xff] }
 0x17f   : > { %v479_v31 = vrot.slane %v1713_v25, 1  ;;  %v498_v33 = vrot.slane %v1713_v25, 2  ;;  %508 = vrot.lane.b32.xlu0 %v472_v17, %s1508_s19  ;;  %531 = vrot.lane.b32.xlu1 %v489_v18, %s1509_s20  ;;  %v448_v34 = vpop.f32.mrb[7].mxu0  ;;  %v925_v18 = vld [vmem:[%s1885_s4 + $0x20] sm:$0xff] }
 0x180   : > { %v477_v35 = vrot.slane %v448_v34, 1  ;;  %v496_v36 = vrot.slane %v448_v34, 2  ;;  %v929_v24 = vld [vmem:[%s1885_s4 + $0x40] sm:$0xff] }
 0x181   : > { %v483_v37 = vsel %vm465_vm10, %v479_v31, %v466_v5  ;;  %v502_v38 = vsel %vm484_vm11, %v498_v33, %v485_v6 }
 0x182   : > { %v480_v39 = vsel %vm465_vm10, %v477_v35, %v479_v31  ;;  %v478_v40 = vsel %vm465_vm10, %v475_v20, %v477_v35  ;;  %v499_v41 = vsel %vm484_vm11, %v496_v36, %v498_v33  ;;  %v497_v42 = vsel %vm484_vm11, %v494_v21, %v496_v36  ;;  %v927_v21 = vld [vmem:[%s1885_s4 + $0x30] sm:$0xff]  ;;  %v933_v31 = vld [vmem:[%s1885_s4 + $0x60] sm:$0xff]  ;;  %v934_v33 = vld [vmem:[%s1885_s4 + $0x68] sm:$0xff] }
 0x183   : > { %533 = vrot.lane.b32.xlu0 %v491_v19, %s1509_s20  ;;  %510 = vrot.lane.b32.xlu1 %v474_v26, %s1508_s19  ;;  %v926_v19 = vld [vmem:[%s1885_s4 + $0x28] sm:$0xff]  ;;  %v935_v35 = vld [vmem:[%s1885_s4 + $0x70] sm:$0xff]  ;;  %vm959_vm10 = vcmask 1043459   ;;  %vm962_vm11 = vcmask 1044484  }
 0x184   : > { %v1378_v20 = vpack.c.bf16 %v926_v19, %v925_v18  ;;  %v936_v36 = vld [vmem:[%s1885_s4 + $0x78] sm:$0xff] }
 0x187   : > { %512 = vrot.lane.b32.xlu0 %v476_v27, %s1508_s19  ;;  %535 = vrot.lane.b32.xlu1 %v493_v29, %s1509_s20  ;;  %v931_v27 = vld [vmem:[%s1885_s4 + $0x50] sm:$0xff]  ;;  %v932_v29 = vld [vmem:[%s1885_s4 + $0x58] sm:$0xff] }
 0x18b   : > { %537 = vrot.lane.b32.xlu0 %v495_v30, %s1509_s20  ;;  %518 = vrot.lane.b32.xlu1 %v483_v37, %s1508_s19  ;;  %v1387_v30 = vpack.c.bf16 %v932_v29, %v931_v27  ;;  %v1393_v37 = vpack.c.bf16 %v936_v36, %v935_v35 }
 0x18f   : > { %516 = vrot.lane.b32.xlu0 %v480_v39, %s1508_s19  ;;  %514 = vrot.lane.b32.xlu1 %v478_v40, %s1508_s19  ;;  %s1839_s19 = scalar_lea.hbm %s1887_s6, %s1153_s15 }
 0x193   : > { %541 = vrot.lane.b32.xlu0 %v499_v41, %s1509_s20  ;;  %539 = vrot.lane.b32.xlu1 %v497_v42, %s1509_s20 }
 0x197   : > { %543 = vrot.lane.b32.xlu1 %v502_v38, %s1509_s20  ;;  %v714_v38 = vshrl.u32 %v260_v28, 7  ;;  %s1046_s20 = scalar_lea.sflag [#allocation3], %s243_s11 }
 0x199   : > { %v715_v39 = vadd.s32 8, %v714_v38  ;;  %v726_v41 = vand.u32 7, %v714_v38  ;;  %v717_v42 = vadd.s32 24, %v714_v38 }
 0x19b   : > { %v733_v40 = vand.u32 7, %v715_v39  ;;  %vm818_vm1 = vcmp.lt.s32.totalorder %v726_v41, 6 }
 0x19d   : > { %vm819_vm0 = vcmp.lt.s32.totalorder %v733_v40, 6 }
 0x1e9   : > { %v505_v43 = vpop.permute.xlu0 %504 }
 0x1ea   : > { %v554_v44 = vsel %vm553_vm12, %v418_v4, %v505_v43  ;;  %v716_v43 = vadd.s32 16, %v714_v38 }
 0x1ed   : > { %v507_v45 = vpop.permute.xlu1 %506  ;;  %v530_v46 = vpop.permute.xlu0 %529 }
 0x1ee   : > { %v563_v47 = vsel %vm562_vm13, %v554_v44, %v530_v46  ;;  %v555_v48 = vsel %vm553_vm12, %v1692_v1, %v507_v45 }
 0x1ef   : > { %1276 = vmatprep.mubr.msk.f32.mxu1 %vm583_vm14, %v563_v47 }
 0x1f1   : > { %v532_v49 = vpop.permute.xlu1 %531  ;;  %v509_v50 = vpop.permute.xlu0 %508 }
 0x1f2   : > { %v564_v51 = vsel %vm562_vm13, %v555_v48, %v532_v49  ;;  %v556_v52 = vsel %vm553_vm12, %v428_v12, %v509_v50  ;;  %v922_v12 = vld [vmem:[%s1885_s4 + $0x8] sm:$0xff]  ;;  %v747_v49 = vand.u32 7, %v717_v42 }
 0x1f3   : > { %1277 = vmatmul.mubr.msk.f32.vlgmr.msra.gmra.mrb[0].mxu1 %vm583_vm14, %v564_v51  ;;  %v1372_v13 = vpack.c.bf16 %v922_v12, %v921_v11  ;;  %v740_v51 = vand.u32 7, %v716_v43 }
 0x1f4   : > { %vm821_vm2 = vcmp.lt.s32.totalorder %v747_v49, 6 }
 0x1f5   : > { %v511_v53 = vpop.permute.xlu1 %510  ;;  %v534_v54 = vpop.permute.xlu0 %533  ;;  %1373 = vmatpush3.bf16.msra.mxu1 %v1372_v13  ;;  %vm820_vm3 = vcmp.lt.s32.totalorder %v740_v51, 6 }
 0x1f6   : > { %v565_v55 = vsel %vm562_vm13, %v556_v52, %v534_v54  ;;  %v557_v56 = vsel %vm553_vm12, %v1696_v7, %v511_v53  ;;  %1374 = vmatprep.subr.bf16.mxu1 %v1510_v14 }
 0x1f7   : > { %1279 = vmatprep.mubr.msk.f32.mxu1 %vm583_vm14, %v565_v55 }
 0x1f9   : > { %v536_v57 = vpop.permute.xlu1 %535  ;;  %v513_v58 = vpop.permute.xlu0 %512 }
 0x1fa   : > { %v566_v59 = vsel %vm562_vm13, %v557_v56, %v536_v57  ;;  %v558_v60 = vsel %vm553_vm12, %v438_v22, %v513_v58  ;;  %v928_v22 = vld [vmem:[%s1885_s4 + $0x38] sm:$0xff] }
 0x1fb   : > { %1280 = vmatmul.mubr.msk.f32.gmra.mrb[2].mxu1 %vm583_vm14, %v566_v59  ;;  %v1381_v23 = vpack.c.bf16 %v928_v22, %v927_v21 }
 0x1fd   : > { %v519_v61 = vpop.permute.xlu1 %518  ;;  %v538_v62 = vpop.permute.xlu0 %537 }
 0x1fe   : > { %v567_v63 = vsel %vm562_vm13, %v558_v60, %v538_v62  ;;  %v561_v8 = vsel %vm553_vm12, %v1713_v25, %v519_v61  ;;  %v930_v25 = vld [vmem:[%s1885_s4 + $0x48] sm:$0xff]  ;;  %v719_v62 = vadd.s32 40, %v714_v38 }
 0x1ff   : > { %1282 = vmatprep.mubr.msk.f32.mxu1 %vm583_vm14, %v567_v63  ;;  %v1384_v26 = vpack.c.bf16 %v930_v25, %v929_v24  ;;  %v1821_v63 = vld [vmem:[%s1884_s3] ss:$0 sm:$0xff] }
 0x201   : > { %v515_v0 = vpop.permute.xlu1 %514  ;;  %v517_v1 = vpop.permute.xlu0 %516 }
 0x202   : > { %v559_v2 = vsel %vm553_vm12, %v1703_v15, %v515_v0  ;;  %v560_v3 = vsel %vm553_vm12, %v448_v34, %v517_v1  ;;  %v923_v15 = vld [vmem:[%s1885_s4 + $0x10] sm:$0xff]  ;;  %v1390_v34 = vpack.c.bf16 %v934_v33, %v933_v31  ;;  %vm965_vm12 = vcmask 1045509  }
 0x203   : > { %v1375_v17 = vpack.c.bf16 %v924_v16, %v923_v15 }
 0x205   : > { %v540_v4 = vpop.permute.xlu1 %539  ;;  %v542_v5 = vpop.permute.xlu0 %541  ;;  %1376 = vmatpush3.bf16.msra.mxu1 %v1375_v17 }
 0x206   : > { %v568_v6 = vsel %vm562_vm13, %v559_v2, %v540_v4  ;;  %v569_v7 = vsel %vm562_vm13, %v560_v3, %v542_v5  ;;  %1377 = vmatprep.subr.bf16.mxu1 %v1510_v14  ;;  %v718_v2 = vadd.s32 32, %v714_v38 }
 0x207   : > { %1283 = vmatmul.mubr.msk.f32.gmra.mrb[4].mxu1 %vm583_vm14, %v568_v6 }
 0x208   : > { %1285 = vmatprep.mubr.msk.f32.mxu1 %vm583_vm14, %v569_v7  ;;  %v754_v13 = vand.u32 7, %v718_v2 }
 0x209   : > { %v544_v9 = vpop.permute.xlu1 %543  ;;  %1379 = vmatpush3.bf16.msra.mxu1 %v1378_v20 }
 0x20a   : > { %v570_v10 = vsel %vm562_vm13, %v561_v8, %v544_v9  ;;  %1380 = vmatprep.subr.bf16.mxu1 %v1510_v14  ;;  %v761_v9 = vand.u32 7, %v719_v62  ;;  %vm822_vm6 = vcmp.lt.s32.totalorder %v754_v13, 6  ;;  %vm968_vm13 = vcmask 1046534  }
 0x20b   : > { %1286 = vmatmul.mubr.msk.f32.gmra.mrb[6].mxu1 %vm583_vm14, %v570_v10  ;;  %v721_v10 = vadd.s32 56, %v714_v38  ;;  %vm971_vm14 = vcmask 1047559  }
 0x20c   : > { %1320 = vmatprep.mubr.msk.f32.mxu1 %vm1511_vm15, %v1507_v32  ;;  %vm823_vm5 = vcmp.lt.s32.totalorder %v761_v9, 6 }
 0x20d   : > { %1382 = vmatpush3.bf16.msra.mxu1 %v1381_v23  ;;  %v775_v21 = vand.u32 7, %v721_v10 }
 0x20e   : > { %1383 = vmatprep.subr.bf16.mxu1 %v1510_v14 }
 0x20f   : > { %vm825_vm7 = vcmp.lt.s32.totalorder %v775_v21, 6 }
 0x211   : > { %1385 = vmatpush3.bf16.msra.mxu1 %v1384_v26 }
 0x212   : > { %1386 = vmatprep.subr.bf16.mxu1 %v1510_v14 }
 0x215   : > { %1388 = vmatpush3.bf16.msra.mxu1 %v1387_v30 }
 0x216   : > { %1389 = vmatprep.subr.bf16.mxu1 %v1510_v14 }
 0x219   : > { %1391 = vmatpush3.bf16.msra.mxu1 %v1390_v34 }
 0x21a   : > { %1392 = vmatprep.subr.bf16.mxu1 %v1510_v14  ;;  %v720_v14 = vadd.s32 48, %v714_v38 }
 0x21c   : > { %v768_v23 = vand.u32 7, %v720_v14 }
 0x21d   : > { %1394 = vmatpush3.bf16.msra.mxu1 %v1393_v37 }
 0x21e   : > { %vm824_vm8 = vcmp.lt.s32.totalorder %v768_v23, 6 }
 0x2c6   : > { %v1278_v44 = vpop.f32.mrb[0].mxu1 }
 0x2c7   : > { %v843_v45 = vsel %vm819_vm0, %v1278_v44, -1e+30  ;;  %v674_v46 = vpop.f32.mrb[1].mxu1 }
 0x2c8   : > { %v856_v47 = vrot.slane %v843_v45, 4  ;;  %v842_v48 = vsel %vm818_vm1, %v674_v46, -1e+30 }
 0x2c9   : > { %v850_v50 = vrot.slane %v842_v48, 4 }
 0x2ca   : > { %v857_v52 = vmax.f32 %v843_v45, %v856_v47 }
 0x2cb   : > { %v851_v53 = vmax.f32 %v842_v48, %v850_v50 }
 0x2cc   : > { %v858_v32 = vrot.slane %v857_v52, 2 }
 0x2cd   : > { %v852_v28 = vrot.slane %v851_v53, 2 }
 0x2ce   : > { %v859_v54 = vmax.f32 %v857_v52, %v858_v32  ;;  %v1281_v55 = vpop.f32.mrb[2].mxu1 }
 0x2cf   : > { %v853_v56 = vmax.f32 %v851_v53, %v852_v28  ;;  %v845_v57 = vsel %vm821_vm2, %v1281_v55, -1e+30  ;;  %v684_v58 = vpop.f32.mrb[3].mxu1 }
 0x2d0   : > { %v860_v59 = vrot.slane %v859_v54, 1  ;;  %v868_v60 = vrot.slane %v845_v57, 4  ;;  %v844_v61 = vsel %vm820_vm3, %v684_v58, -1e+30 }
 0x2d1   : > { %v854_v0 = vrot.slane %v853_v56, 1  ;;  %v862_v1 = vrot.slane %v844_v61, 4 }
 0x2d2   : > { %v861_v3 = vmax.f32 %v859_v54, %v860_v59  ;;  %v869_v4 = vmax.f32 %v845_v57, %v868_v60 }
 0x2d3   : > { %v855_v5 = vmax.f32 %v853_v56, %v854_v0  ;;  %v863_v6 = vmax.f32 %v844_v61, %v862_v1 }
 0x2d4   : > { %v906_v7 = vadd.f32 %v1821_v63, %v861_v3  ;;  %v870_v8 = vrot.slane %v869_v4, 2 }
 0x2d5   : > { %v905_v11 = vadd.f32 %v1821_v63, %v855_v5  ;;  %v864_v12 = vrot.slane %v863_v6, 2 }
 0x2d6   : > { %v914_v15 = vmax.f32 %v906_v7, 0.0  ;;  %v871_v16 = vmax.f32 %v869_v4, %v870_v8 }
 0x2d7   : > { %v913_v17 = vmax.f32 %v905_v11, 0.0  ;;  %v865_v18 = vmax.f32 %v863_v6, %v864_v12 }
 0x2d8   : > { %v952_v19 = vrot.slane %v914_v15, 7  ;;  %v872_v20 = vrot.slane %v871_v16, 1 }
 0x2d9   : > { %v866_v22 = vrot.slane %v865_v18, 1 }
 0x2da   : > { %v954_v24 = vsel %vm953_vm4, %v952_v19, %v913_v17  ;;  %v873_v25 = vmax.f32 %v871_v16, %v872_v20  ;;  %v1284_v26 = vpop.f32.mrb[4].mxu1 }
 0x2db   : > { %v867_v27 = vmax.f32 %v865_v18, %v866_v22  ;;  %v847_v29 = vsel %vm823_vm5, %v1284_v26, -1e+30  ;;  %v694_v30 = vpop.f32.mrb[5].mxu1 }
 0x2dc   : > { %v908_v31 = vadd.f32 %v1821_v63, %v873_v25  ;;  %v880_v33 = vrot.slane %v847_v29, 4  ;;  %v846_v34 = vsel %vm822_vm6, %v694_v30, -1e+30 }
 0x2dd   : > { %v907_v35 = vadd.f32 %v1821_v63, %v867_v27  ;;  %v874_v36 = vrot.slane %v846_v34, 4 }
 0x2de   : > { %v916_v37 = vmax.f32 %v908_v31, 0.0  ;;  %v881_v38 = vmax.f32 %v847_v29, %v880_v33  ;;  %v1287_v39 = vpop.f32.mrb[6].mxu1 }
 0x2df   : > { %v915_v40 = vmax.f32 %v907_v35, 0.0  ;;  %v875_v41 = vmax.f32 %v846_v34, %v874_v36  ;;  %v849_v42 = vsel %vm825_vm7, %v1287_v39, -1e+30  ;;  %v704_v43 = vpop.f32.mrb[7].mxu1 }
 0x2e0   : > { %v882_v44 = vrot.slane %v881_v38, 2  ;;  %v892_v45 = vrot.slane %v849_v42, 4  ;;  %v848_v46 = vsel %vm824_vm8, %v704_v43, -1e+30  ;;  %v958_v50 = vrot.slane %v916_v37, 5 }
 0x2e1   : > { %v955_v47 = vrot.slane %v915_v40, 6  ;;  %v876_v48 = vrot.slane %v875_v41, 2  ;;  %v886_v49 = vrot.slane %v848_v46, 4 }
 0x2e2   : > { %v883_v51 = vmax.f32 %v881_v38, %v882_v44  ;;  %v893_v52 = vmax.f32 %v849_v42, %v892_v45 }
 0x2e3   : > { %v957_v53 = vsel %vm956_vm9, %v955_v47, %v954_v24  ;;  %v877_v32 = vmax.f32 %v875_v41, %v876_v48  ;;  %v887_v28 = vmax.f32 %v848_v46, %v886_v49 }
 0x2e4   : > { %v884_v54 = vrot.slane %v883_v51, 1  ;;  %v894_v55 = vrot.slane %v893_v52, 2  ;;  %v960_v56 = vsel %vm959_vm10, %v958_v50, %v957_v53 }
 0x2e5   : > { %v878_v57 = vrot.slane %v877_v32, 1  ;;  %v888_v58 = vrot.slane %v887_v28, 2 }
 0x2e6   : > { %v885_v59 = vmax.f32 %v883_v51, %v884_v54  ;;  %v895_v60 = vmax.f32 %v893_v52, %v894_v55 }
 0x2e7   : > { %v879_v61 = vmax.f32 %v877_v32, %v878_v57  ;;  %v889_v62 = vmax.f32 %v887_v28, %v888_v58 }
 0x2e8   : > { %v910_v0 = vadd.f32 %v1821_v63, %v885_v59  ;;  %v896_v1 = vrot.slane %v895_v60, 1 }
 0x2e9   : > { %v909_v2 = vadd.f32 %v1821_v63, %v879_v61  ;;  %v890_v3 = vrot.slane %v889_v62, 1 }
 0x2ea   : > { %v918_v4 = vmax.f32 %v910_v0, 0.0  ;;  %v897_v5 = vmax.f32 %v895_v60, %v896_v1 }
 0x2eb   : > { %v917_v6 = vmax.f32 %v909_v2, 0.0  ;;  %v891_v7 = vmax.f32 %v889_v62, %v890_v3 }
 0x2ec   : > { %v912_v8 = vadd.f32 %v1821_v63, %v897_v5  ;;  %v964_v11 = vrot.slane %v918_v4, 3 }
 0x2ed   : > { %v961_v9 = vrot.slane %v917_v6, 4  ;;  %v911_v10 = vadd.f32 %v1821_v63, %v891_v7  ;;  %v1151_v63 = vld [vmem:[%s1886_s5] ss:$0 sm:$0xff] }
 0x2ee   : > { %v920_v12 = vmax.f32 %v912_v8, 0.0 }
 0x2ef   : > { %v919_v13 = vmax.f32 %v911_v10, 0.0  ;;  %v963_v14 = vsel %vm962_vm11, %v961_v9, %v960_v56 }
 0x2f0   : > { %v966_v15 = vsel %vm965_vm12, %v964_v11, %v963_v14  ;;  %v970_v17 = vrot.slane %v920_v12, 1 }
 0x2f1   : > { %v967_v16 = vrot.slane %v919_v13, 2 }
 0x2f3   : > { %v969_v18 = vsel %vm968_vm13, %v967_v16, %v966_v15 }
 0x2f4   : > { %v972_v19 = vsel %vm971_vm14, %v970_v17, %v969_v18 }
 0x2f5   : > { %1321 = vmatmul.mubr.f32.vlgmr.msra.gmra.mrb[8].mxu1 %v972_v19 }
 0x3c8   : > { %v1040_v20 = vpop.f32.mrb[8].mxu1 }
 0x3c9   : > { %v1041_v21 = vadd.f32 %v1151_v63, %v1040_v20  ;;  %v1322_v22 = vpop.f32.mrb[9].mxu1 }
 0x3cb   : > { %1044 = vst [vmem:[%s245_s9] sm:$0xff] %v1041_v21 }
 0x3cc   : > { %1455 = shalt.err (!%p1452_p3)
}
 0x3cd   : > { %s1456_s10 = scalar_lea.hbm %s1839_s19, 128  ;;  %s1460_s13 = scalar_lea.hbm %s1887_s6, 256 }
 0x3ce   : > { %p1457_p4 = scmp.ne.s32.totalorder %s1839_s19, %s1456_s10  ;;  %p1461_p9 = scmp.lt.u32.totalorder %s1839_s19, %s1887_s6 }
 0x3cf   : > { %p1462_p10 = scmp.lt.u32.totalorder %s1460_s13, %s1456_s10  ;;  %p1464_p12 = scmp.lt.u32.totalorder %s1456_s10, %s1839_s19 }
 0x3d0   : > { %p1458_p7 = pnand %p1457_p4, %p1586_p5 }
 0x3d1   : > { %p1463_p11 = por %p1462_p10, %p1461_p9 }
 0x3d2   : > { %p1459_p8 = pneg %p1458_p7 }
 0x3d3   : > { %p1465_p13 = por %p1464_p12, %p1463_p11 }
 0x3d5   : > { %p1466_p0 = pnand %p1465_p13, %p1459_p8 }
 0x3d7   : > { %1469 = shalt.err (!%p1466_p0)
}
 0x3d8   : > { %1395 = dma.vmem_to_hbm [thread:$0]  (%p1586_p5), %s1841_s16, 128, %s1839_s19, %s1046_s20  }
 0x3d9 PF: > { %p1401_p1 = scmp.ge.s32.totalorder %s1504_s24, 2  ;;  %s1071_s9 = sand.u32 1, %s1492_s21  }
 0x3da   : > { %s1072_s17 = scalar_lea.sflag [#allocation3], %s1071_s9 }
 0x3db   : > { %p1398_p2 = pnand %p1401_p1, %p1590_p6 }
 0x3dd   : > { %1487 = dma.done.wait (!%p1398_p2), %s1072_s17, 128  }
 0x3de   : > { %1489 = vsyncadd (!%p1398_p2), %s1072_s17, 4294967168  ;;  %p16_p3 = scmp.ge.s32.totalorder %s1573_s27, 4   ;;  %s1890_s21 = smov %s1496_s22 }
 0x3df   : > { %s1891_s22 = smov %s1500_s23  ;;  %s1892_s23 = smov %s1584_s30 }
 0x3e0   : > { %s1893_s24 = smov %s1573_s27  ;;  %18 = sbr.rel (!%p16_p3) target bundleno = 3 (0x3), region = 79 }
 0x3e7   :  { %1077 = vsyncpa [#allocation3], 1 }
 0x3e8   :  { %1079 = vsyncpa [#allocation3 + $0x1], 1 }

</bundles_post_ra>
